<compile_context>
chip_gen: v7x
topology: tpu7x:2x2x1
jax: 0.10.0
libtpu: 0.0.40
codegen_flags: <defaults>
</compile_context>

<pallas_src>
import functools
import math

import jax
import jax.numpy as jnp
from jax import lax
from jax.experimental import pallas as pl
from jax.experimental.pallas import tpu as pltpu

_LN_EPS = 1e-5


def _vmem_limit_bytes():
    # ~5/8 of physical VMEM: v5e/v6e (128 MiB) -> 80 MiB, v7x (64 MiB) -> 40 MiB.
    try:
        cap = pltpu.get_tpu_info().vmem_capacity_bytes
        return int(min(96 * 1024 * 1024, max(32 * 1024 * 1024, (cap * 5) // 8)))
    except Exception:
        return 48 * 1024 * 1024


def _pick_tile(n, candidates):
    for c in candidates:
        if n >= c and n % c == 0:
            return c
    return n


def _layernorm(x, gamma, beta, eps=_LN_EPS):
    mu = jnp.mean(x, axis=-1, keepdims=True)
    xc = x - mu
    var = jnp.mean(xc * xc, axis=-1, keepdims=True)
    return xc * lax.rsqrt(var + eps) * gamma + beta


# ---------------- kernel 1: LayerNorm1 + fused QKV projection ----------------
def ln_qkv_kernel(x_ref, wqkv_ref, bqkv_ref, ln1_ref, qkv_ref):
    x = x_ref[0].astype(jnp.float32)                      # (tr, D)
    ln = ln1_ref[...]                                     # (2, D): [gamma; beta]
    h = _layernorm(x, ln[0:1, :], ln[1:2, :])
    qkv = jnp.dot(h.astype(jnp.bfloat16), wqkv_ref[...],
                  preferred_element_type=jnp.float32)     # (tr, 3D)
    qkv = qkv + bqkv_ref[...]
    qkv_ref[0] = qkv.astype(qkv_ref.dtype)


# ------- kernel 2: flash attention (heads batched, online softmax over KV) ---
def flash_attn_kernel(q_ref, k_ref, v_ref, o_ref, qh_sc, m_sc, l_sc, acc_sc, *,
                      num_heads, head_dim):
    H, hd = num_heads, head_dim
    tq = q_ref.shape[1]
    tk = k_ref.shape[1]
    ki = pl.program_id(2)

    @pl.when(ki == 0)
    def _():
        # (tq, D) -> (H, tq, hd) once per q tile; softmax scale already folded
        # into the Q columns of the fused QKV weights.
        qh_sc[...] = jnp.transpose(q_ref[0].reshape(tq, H, hd), (1, 0, 2))
        m_sc[...] = jnp.full(m_sc.shape, -jnp.inf, m_sc.dtype)
        l_sc[...] = jnp.zeros(l_sc.shape, l_sc.dtype)
        acc_sc[...] = jnp.zeros(acc_sc.shape, acc_sc.dtype)

    kh = jnp.transpose(k_ref[0].reshape(tk, H, hd), (1, 0, 2))   # (H, tk, hd) bf16
    vh = jnp.transpose(v_ref[0].reshape(tk, H, hd), (1, 0, 2))   # (H, tk, hd) bf16

    # scores (H, tq, tk): one batched MXU call over all heads
    s = lax.dot_general(qh_sc[...], kh, (((2,), (2,)), ((0,), (0,))),
                        preferred_element_type=jnp.float32)

    m_prev = m_sc[...]
    m_new = jnp.maximum(m_prev, jnp.max(s, axis=-1, keepdims=True))
    alpha = jnp.exp(m_prev - m_new)
    p = jnp.exp(s - m_new)
    l_sc[...] = alpha * l_sc[...] + jnp.sum(p, axis=-1, keepdims=True)
    acc_sc[...] = alpha * acc_sc[...] + lax.dot_general(
        p.astype(vh.dtype), vh, (((2,), (1,)), ((0,), (0,))),
        preferred_element_type=jnp.float32)                      # (H, tq, hd)
    m_sc[...] = m_new

    @pl.when(ki == pl.num_programs(2) - 1)
    def _():
        inv = pl.reciprocal(l_sc[...], approx=True)
        o = acc_sc[...] * inv                                    # (H, tq, hd) f32
        # lane-dense store: (H, tq, hd) -> (tq, D)
        o_ref[0] = jnp.transpose(o, (1, 0, 2)).reshape(tq, H * hd).astype(o_ref.dtype)


# ---- kernel 3: out-projection + residual + LayerNorm2 + FFN + residual ------
# FFN reduction dimension (d_ff) is tiled on grid axis 2.
def proj_ffn_kernel(attn_ref, x_ref, wo_ref, w1_ref, w2_ref, vec_ref, bf1_ref,
                    o_ref, h2_sc, acc_sc):
    j = pl.program_id(2)

    @pl.when(j == 0)
    def _():
        vecs = vec_ref[...]                               # (4, D): [bo; g2; be2; bf2]
        bo, g2, be2, bf2 = vecs[0:1, :], vecs[1:2, :], vecs[2:3, :], vecs[3:4, :]
        a = attn_ref[0]                                   # (tr, D) bf16
        x = x_ref[0].astype(jnp.float32)                  # (tr, D)
        proj = jnp.dot(a, wo_ref[...], preferred_element_type=jnp.float32) + bo
        x1 = x + proj                                     # residual 1 (dropout == id)
        h2_sc[...] = _layernorm(x1, g2, be2).astype(jnp.bfloat16)
        acc_sc[...] = x1 + bf2                            # residual 2 + final bias

    f = jnp.dot(h2_sc[...], w1_ref[...],
                preferred_element_type=jnp.float32) + bf1_ref[...]
    f = jnp.maximum(f, 0.0)                               # ReLU
    acc_sc[...] += jnp.dot(f.astype(jnp.bfloat16), w2_ref[...],
                           preferred_element_type=jnp.float32)

    @pl.when(j == pl.num_programs(2) - 1)
    def _():
        o_ref[0] = acc_sc[...].astype(o_ref.dtype)        # (dropout == id)


# --------------------------------- wrapper -----------------------------------
def transformer_encoder_layer(x, params, *, num_heads):
    B, L, D = x.shape
    H = num_heads
    assert D % H == 0, "d_model must be divisible by num_heads"
    hd = D // H
    d_ff = params["w1"].shape[1]
    wdt = jnp.bfloat16
    scale = 1.0 / math.sqrt(hd)

    # --- parameter fusion / packing; fold softmax scale into Q projection ---
    w_qkv = jnp.concatenate(
        [params["wq"] * scale, params["wk"], params["wv"]], axis=1).astype(wdt)  # (D, 3D)
    b_qkv = jnp.concatenate(
        [params["bq"] * scale, params["bk"], params["bv"]], axis=1)              # (1, 3D)
    ln1 = jnp.concatenate([params["g1"], params["be1"]], axis=0)                 # (2, D)
    wo = params["wo"].astype(wdt)                                                # (D, D)
    w1 = params["w1"].astype(wdt)                                                # (D, d_ff)
    w2 = params["w2"].astype(wdt)                                                # (d_ff, D)
    vec4 = jnp.concatenate(
        [params["bo"], params["g2"], params["be2"], params["bf2"]], axis=0)      # (4, D)
    bf1 = params["bf1"]                                                          # (1, d_ff)

    # --- tile sizes (full extent when small, else multiples of 8/128) ---
    tr = _pick_tile(L, (512, 256, 128))      # row tile for kernels 1 & 3
    tq = _pick_tile(L, (256, 128))           # attention q tile
    tk = tq                                  # attention kv tile
    tf = _pick_tile(d_ff, (512,))            # FFN reduction tile (bounds VMEM)

    vmem = _vmem_limit_bytes()

    # ---------------- 1) LayerNorm1 + fused QKV projection -------------------
    qkv = pl.pallas_call(
        ln_qkv_kernel,
        out_shape=jax.ShapeDtypeStruct((B, L, 3 * D), jnp.bfloat16),
        grid_spec=pltpu.PrefetchScalarGridSpec(
            num_scalar_prefetch=0,
            grid=(B, L // tr),
            in_specs=[
                pl.BlockSpec((1, tr, D), lambda b, i: (b, i, 0)),
                pl.BlockSpec((D, 3 * D), lambda b, i: (0, 0)),
                pl.BlockSpec((1, 3 * D), lambda b, i: (0, 0)),
                pl.BlockSpec((2, D), lambda b, i: (0, 0)),
            ],
            out_specs=pl.BlockSpec((1, tr, 3 * D), lambda b, i: (b, i, 0)),
        ),
        compiler_params=pltpu.CompilerParams(
            dimension_semantics=("parallel", "parallel"),
            vmem_limit_bytes=vmem),
    )(x, w_qkv, b_qkv, ln1)

    # ---------------- 2) flash attention over KV tiles -----------------------
    # Q/K/V are read as lane-dense column blocks (0/1/2) of the fused qkv tensor;
    # head split/merge happens in VMEM, output is a lane-dense (B, L, D) tensor.
    attn = pl.pallas_call(
        functools.partial(flash_attn_kernel, num_heads=H, head_dim=hd),
        out_shape=jax.ShapeDtypeStruct((B, L, D), jnp.bfloat16),
        grid_spec=pltpu.PrefetchScalarGridSpec(
            num_scalar_prefetch=0,
            grid=(B, L // tq, L // tk),
            in_specs=[
                pl.BlockSpec((1, tq, D), lambda b, qi, ki: (b, qi, 0)),   # Q cols
                pl.BlockSpec((1, tk, D), lambda b, qi, ki: (b, ki, 1)),   # K cols
                pl.BlockSpec((1, tk, D), lambda b, qi, ki: (b, ki, 2)),   # V cols
            ],
            out_specs=pl.BlockSpec((1, tq, D), lambda b, qi, ki: (b, qi, 0)),
            scratch_shapes=[
                pltpu.VMEM((H, tq, hd), jnp.bfloat16),   # head-major Q cache
                pltpu.VMEM((H, tq, 1), jnp.float32),     # running max
                pltpu.VMEM((H, tq, 1), jnp.float32),     # running denom
                pltpu.VMEM((H, tq, hd), jnp.float32),    # accumulator
            ],
        ),
        compiler_params=pltpu.CompilerParams(
            dimension_semantics=("parallel", "parallel", "arbitrary"),
            vmem_limit_bytes=vmem),
    )(qkv, qkv, qkv)

    # ---- 3) out-projection + residual + LayerNorm2 + FFN + residual ---------
    out = pl.pallas_call(
        proj_ffn_kernel,
        out_shape=jax.ShapeDtypeStruct((B, L, D), x.dtype),
        grid_spec=pltpu.PrefetchScalarGridSpec(
            num_scalar_prefetch=0,
            grid=(B, L // tr, d_ff // tf),
            in_specs=[
                pl.BlockSpec((1, tr, D), lambda b, i, j: (b, i, 0)),   # attention out
                pl.BlockSpec((1, tr, D), lambda b, i, j: (b, i, 0)),   # residual x
                pl.BlockSpec((D, D), lambda b, i, j: (0, 0)),          # wo
                pl.BlockSpec((D, tf), lambda b, i, j: (0, j)),         # w1 col tile
                pl.BlockSpec((tf, D), lambda b, i, j: (j, 0)),         # w2 row tile
                pl.BlockSpec((4, D), lambda b, i, j: (0, 0)),          # bo/g2/be2/bf2
                pl.BlockSpec((1, tf), lambda b, i, j: (0, j)),         # bf1 tile
            ],
            out_specs=pl.BlockSpec((1, tr, D), lambda b, i, j: (b, i, 0)),
            scratch_shapes=[
                pltpu.VMEM((tr, D), jnp.bfloat16),    # LayerNorm2 output (FFN input)
                pltpu.VMEM((tr, D), jnp.float32),     # FFN accumulator (+ residual)
            ],
        ),
        compiler_params=pltpu.CompilerParams(
            dimension_semantics=("parallel", "parallel", "arbitrary"),
            vmem_limit_bytes=vmem),
    )(attn, x, wo, w1, w2, vec4, bf1)

    return out


# ---------------- pure-JAX reference (for correctness check) -----------------
def reference(x, p, num_heads):
    B, L, D = x.shape
    hd = D // num_heads

    def ln(v, g, b, eps=_LN_EPS):
        mu = v.mean(-1, keepdims=True)
        var = ((v - mu) ** 2).mean(-1, keepdims=True)
        return (v - mu) / jnp.sqrt(var + eps) * g + b

    h = ln(x, p["g1"][0], p["be1"][0])
    q = h @ p["wq"] + p["bq"][0]
    k = h @ p["wk"] + p["bk"][0]
    v = h @ p["wv"] + p["bv"][0]
    q = q.reshape(B, L, num_heads, hd).transpose(0, 2, 1, 3)
    k = k.reshape(B, L, num_heads, hd).transpose(0, 2, 1, 3)
    v = v.reshape(B, L, num_heads, hd).transpose(0, 2, 1, 3)
    s = jnp.einsum("bhqd,bhkd->bhqk", q, k) / jnp.sqrt(hd)
    a = jax.nn.softmax(s, axis=-1)
    o = jnp.einsum("bhqk,bhkd->bhqd", a, v).transpose(0, 2, 1, 3).reshape(B, L, D)
    o = o @ p["wo"] + p["bo"][0]
    x1 = x + o
    h2 = ln(x1, p["g2"][0], p["be2"][0])
    f = jnp.maximum(h2 @ p["w1"] + p["bf1"][0], 0.0) @ p["w2"] + p["bf2"][0]
    return x1 + f


def make_params(key, d_model, d_ff):
    ks = jax.random.split(key, 8)
    s = 0.02
    return {
        "wq": jax.random.normal(ks[0], (d_model, d_model), jnp.float32) * s,
        "wk": jax.random.normal(ks[1], (d_model, d_model), jnp.float32) * s,
        "wv": jax.random.normal(ks[2], (d_model, d_model), jnp.float32) * s,
        "wo": jax.random.normal(ks[3], (d_model, d_model), jnp.float32) * s,
        "bq": jax.random.normal(ks[4], (1, d_model), jnp.float32) * s,
        "bk": jax.random.normal(ks[5], (1, d_model), jnp.float32) * s,
        "bv": jnp.zeros((1, d_model), jnp.float32),
        "bo": jnp.zeros((1, d_model), jnp.float32),
        "g1": jnp.ones((1, d_model), jnp.float32),
        "be1": jnp.zeros((1, d_model), jnp.float32),
        "g2": jnp.ones((1, d_model), jnp.float32),
        "be2": jnp.zeros((1, d_model), jnp.float32),
        "w1": jax.random.normal(ks[6], (d_model, d_ff), jnp.float32) * s,
        "bf1": jnp.zeros((1, d_ff), jnp.float32),
        "w2": jax.random.normal(ks[7], (d_ff, d_model), jnp.float32) * s,
        "bf2": jnp.zeros((1, d_model), jnp.float32),
    }


if __name__ == "__main__":
    B, L, D = 2, 16, 128          # lane-dense: D is a multiple of 128
    NUM_HEADS = 8                 # head_dim = 16
    D_FF = 4 * D

    key = jax.random.PRNGKey(0)
    kx, kp = jax.random.split(key)
    x = jax.random.normal(kx, (B, L, D), jnp.float32)
    params = make_params(kp, D, D_FF)

    # Weights are stored in bf16 by the kernel; use the same (de-quantized)
    # values in the reference so the comparison isolates kernel error.
    for n in ("wq", "wk", "wv", "wo", "w1", "w2"):
        params[n] = params[n].astype(jnp.bfloat16).astype(jnp.float32)

    out = transformer_encoder_layer(x, params, num_heads=NUM_HEADS)
    out = jax.block_until_ready(out)

    ref = reference(x, params, NUM_HEADS)
    assert out.shape == (B, L, D)
    err = float(jnp.max(jnp.abs(out.astype(jnp.float32) - ref)))
    assert err < 3e-2, f"mismatch vs reference: max abs err {err}"

    print("KERNEL_OK")
</pallas_src>

<mosaic_0001>
module attributes {stable_mosaic.version = 11 : i64} {
  func.func @ln_qkv_kernel(%arg0: i32, %arg1: i32, %arg2: memref<1x16x128xf32, #tpu.memory_space<vmem>>, %arg3: memref<128x384xbf16, #tpu.memory_space<vmem>>, %arg4: memref<1x384xf32, #tpu.memory_space<vmem>>, %arg5: memref<2x128xf32, #tpu.memory_space<vmem>>, %arg6: memref<1x16x384xbf16, #tpu.memory_space<vmem>>) attributes {dimension_semantics = [#tpu.dimension_semantics<parallel>, #tpu.dimension_semantics<parallel>], iteration_bounds = array<i64: 2, 1>, scalar_prefetch = 0 : i64, scratch_operands = 0 : i64, tpu.core_type = #tpu.core_type<tc>, window_params = [{transform_indices = @transform_0, window_bounds = array<i64: 1, 16, 128>}, {pipeline_mode = #tpu.pipeline_mode<synchronous>, transform_indices = @transform_1, window_bounds = array<i64: 128, 384>}, {pipeline_mode = #tpu.pipeline_mode<synchronous>, transform_indices = @transform_2, window_bounds = array<i64: 1, 384>}, {pipeline_mode = #tpu.pipeline_mode<synchronous>, transform_indices = @transform_3, window_bounds = array<i64: 2, 128>}, {transform_indices = @transform_4, window_bounds = array<i64: 1, 16, 384>}]} {
    %c0 = arith.constant 0 : index
    %c0_0 = arith.constant 0 : index
    %c0_1 = arith.constant 0 : index
    %0 = vector.load %arg2[%c0, %c0_0, %c0_1] : memref<1x16x128xf32, #tpu.memory_space<vmem>>, vector<1x16x128xf32>
    %1 = vector.shape_cast %0 : vector<1x16x128xf32> to vector<16x128xf32>
    %c0_2 = arith.constant 0 : index
    %c0_3 = arith.constant 0 : index
    %2 = vector.load %arg5[%c0_2, %c0_3] : memref<2x128xf32, #tpu.memory_space<vmem>>, vector<2x128xf32>
    %3 = vector.extract_strided_slice %2 {offsets = [0, 0], sizes = [1, 128], strides = [1, 1]} : vector<2x128xf32> to vector<1x128xf32>
    %4 = vector.extract_strided_slice %2 {offsets = [1, 0], sizes = [1, 128], strides = [1, 1]} : vector<2x128xf32> to vector<1x128xf32>
    %cst = arith.constant dense<0.000000e+00> : vector<16xf32>
    %5 = vector.multi_reduction <add>, %1, %cst [1] : vector<16x128xf32> to vector<16xf32>
    %6 = vector.shape_cast %5 : vector<16xf32> to vector<16x1xf32>
    %cst_4 = arith.constant 1.280000e+02 : f32
    %7 = vector.broadcast %cst_4 : f32 to vector<16x1xf32>
    %8 = arith.divf %6, %7 : vector<16x1xf32>
    %9 = vector.broadcast %8 : vector<16x1xf32> to vector<16x128xf32>
    %10 = arith.subf %1, %9 : vector<16x128xf32>
    %11 = arith.mulf %10, %10 : vector<16x128xf32>
    %cst_5 = arith.constant dense<0.000000e+00> : vector<16xf32>
    %12 = vector.multi_reduction <add>, %11, %cst_5 [1] : vector<16x128xf32> to vector<16xf32>
    %13 = vector.shape_cast %12 : vector<16xf32> to vector<16x1xf32>
    %cst_6 = arith.constant 1.280000e+02 : f32
    %14 = vector.broadcast %cst_6 : f32 to vector<16x1xf32>
    %15 = arith.divf %13, %14 : vector<16x1xf32>
    %cst_7 = arith.constant 9.99999974E-6 : f32
    %16 = vector.broadcast %cst_7 : f32 to vector<16x1xf32>
    %17 = arith.addf %15, %16 : vector<16x1xf32>
    %18 = math.rsqrt %17 : vector<16x1xf32>
    %19 = vector.broadcast %18 : vector<16x1xf32> to vector<16x128xf32>
    %20 = arith.mulf %10, %19 : vector<16x128xf32>
    %21 = vector.broadcast %3 : vector<1x128xf32> to vector<16x128xf32>
    %22 = arith.mulf %20, %21 : vector<16x128xf32>
    %23 = vector.broadcast %4 : vector<1x128xf32> to vector<16x128xf32>
    %24 = arith.addf %22, %23 : vector<16x128xf32>
    %25 = arith.truncf %24 : vector<16x128xf32> to vector<16x128xbf16>
    %c0_8 = arith.constant 0 : index
    %c0_9 = arith.constant 0 : index
    %26 = vector.load %arg3[%c0_8, %c0_9] : memref<128x384xbf16, #tpu.memory_space<vmem>>, vector<128x384xbf16>
    %cst_10 = arith.constant dense<0.000000e+00> : vector<16x384xf32>
    %27 = tpu.matmul %25, %26, %cst_10 {dimension_numbers = #tpu.dot_dimension_numbers<[1], [0], [0], [1], [0, 0, 1, 1], [], []>} : vector<16x128xbf16>, vector<128x384xbf16>, vector<16x384xf32> -> vector<16x384xf32>
    %c0_11 = arith.constant 0 : index
    %c0_12 = arith.constant 0 : index
    %28 = vector.load %arg4[%c0_11, %c0_12] : memref<1x384xf32, #tpu.memory_space<vmem>>, vector<1x384xf32>
    %29 = vector.broadcast %28 : vector<1x384xf32> to vector<16x384xf32>
    %30 = arith.addf %27, %29 : vector<16x384xf32>
    %31 = arith.truncf %30 : vector<16x384xf32> to vector<16x384xbf16>
    %c0_13 = arith.constant 0 : index
    %c0_14 = arith.constant 0 : index
    %c0_15 = arith.constant 0 : index
    %32 = vector.load %arg6[%c0_13, %c0_14, %c0_15] : memref<1x16x384xbf16, #tpu.memory_space<vmem>>, vector<1x16x384xbf16>
    %33 = vector.shape_cast %32 : vector<1x16x384xbf16> to vector<16x384xbf16>
    %34 = vector.shape_cast %31 : vector<16x384xbf16> to vector<1x16x384xbf16>
    tpu.vector_store %arg6[%c0_13, %c0_14, %c0_15], %34 {strides = array<i32>} : memref<1x16x384xbf16, #tpu.memory_space<vmem>>, vector<1x16x384xbf16>,
    return
  }
  func.func @transform_0(%arg0: i32, %arg1: i32) -> (i32, i32, i32) {
    %c0_i32 = arith.constant 0 : i32
    %c0_i32_0 = arith.constant 0 : i32
    return %arg0, %arg1, %c0_i32 : i32, i32, i32
  }
  func.func @transform_1(%arg0: i32, %arg1: i32) -> (i32, i32) {
    %c0_i32 = arith.constant 0 : i32
    %c0_i32_0 = arith.constant 0 : i32
    %c0_i32_1 = arith.constant 0 : i32
    return %c0_i32, %c0_i32_0 : i32, i32
  }
  func.func @transform_2(%arg0: i32, %arg1: i32) -> (i32, i32) {
    %c0_i32 = arith.constant 0 : i32
    %c0_i32_0 = arith.constant 0 : i32
    %c0_i32_1 = arith.constant 0 : i32
    return %c0_i32, %c0_i32_0 : i32, i32
  }
  func.func @transform_3(%arg0: i32, %arg1: i32) -> (i32, i32) {
    %c0_i32 = arith.constant 0 : i32
    %c0_i32_0 = arith.constant 0 : i32
    %c0_i32_1 = arith.constant 0 : i32
    return %c0_i32, %c0_i32_0 : i32, i32
  }
  func.func @transform_4(%arg0: i32, %arg1: i32) -> (i32, i32, i32) {
    %c0_i32 = arith.constant 0 : i32
    %c0_i32_0 = arith.constant 0 : i32
    return %arg0, %arg1, %c0_i32 : i32, i32, i32
  }
}

</mosaic_0001>

<bundles_post_ra>
// kernel: tpu_custom_call.1
= control target key start
LH: loop header
LB: loop body
LE: loop exit
PB: predicated region body
PF: predicated region fallthrough
CT: control target
= control target key end

     0   :  { %9 = vsyncpa [#allocation3], 0  ;;  %s1314_s0 = inlined_call_operand.hbm [shape: f32[2,16,128], index: 0, kind: input, shape index: {}]   ;;  %s1315_s1 = inlined_call_operand.hbm [shape: bf16[128,384], index: 1, kind: input, shape index: {}]   ;;  %s1316_s2 = inlined_call_operand.vmem [shape: f32[1,384], index: 2, kind: input, shape index: {}]   ;;  %s1317_s3 = inlined_call_operand.vmem [shape: f32[2,128], index: 3, kind: input, shape index: {}]   ;;  %s1318_s4 = inlined_call_operand.hbm [shape: bf16[2,16,384], index: 4, kind: output, shape index: {}]  }
   0x1   :  { %11 = vsyncpa [#allocation3 + $0x1], 0 }
   0x2   :  { %12 = vsyncpa [#allocation6], 0 }
   0x3   :  { %13 = vsyncpa [#allocation4], 0 }
   0x4   :  { %15 = vsyncpa [#allocation4 + $0x1], 0  ;;  %s1069_s15 = smov 0   ;;  %s1071_s16 = smov 0  }
   0x5   :  { %s1073_s17 = smov 0   ;;  %s1075_s18 = smov 0  }
   0x6   :  { %s1077_s19 = smov 0   ;;  %s1079_s20 = smov 0  }
   0x7 LB: > { %s690_s21 = sadd.s32 4294967295, %s1030_s20   ;;  %s691_s22 = sadd.s32 4294967294, %s1030_s20   ;;  %s1030_s20 = sphi %s1079_s20, %s21_s20   ;;  %s1026_s19 = sphi %s1077_s19, %s1342_s19   ;;  %s1022_s18 = sphi %s1075_s18, %s1341_s18   ;;  %s1018_s17 = sphi %s1073_s17, %s1340_s17   ;;  %s1014_s16 = sphi %s1071_s16, %s1339_s16   ;;  %s1010_s15 = sphi %s1069_s15, %s1338_s15  }
   0x8   : > { %p55_p0 = scmp.ne.s32.totalorder %s1014_s16, %s1010_s15  ;;  %p1103_p1 = scmp.eq.s32.totalorder %s690_s21, 0 }
   0x9   : > { %p1107_p2 = scmp.eq.s32.totalorder %s690_s21, 1  ;;  %p150_p3 = scmp.eq.s32.totalorder %s691_s22, 1 }
   0xa   : > { %s1323_s23 = scalar_select %p1103_p1, 1, 0 }
   0xb   : > { %s1324_s24 = scalar_select %p1107_p2, 1, 0 }
   0xc   : > { %p1113_p4 = por %p1103_p1, %p55_p0  ;;  %p692_p5 = scmp.ge.s32.totalorder %s1030_s20, 1 }
   0xd   : > { %p1118_p6 = por %p150_p3, %p55_p0  ;;  %p157_p7 = scmp.lt.s32.totalorder %s1030_s20, 3 }
   0xe   : > { %s1325_s25 = scalar_select %p1113_p4, 1, 0 }
   0xf   : > { %s1326_s26 = scalar_select %p1118_p6, 1, 0 }
  0x10   : > { %p1123_p8 = pnand %p692_p5, %p157_p7  ;;  %s1032_s28 = smov [#allocation5]  }
  0x11   : > { %s169_s29 = sshll.u32 %s1032_s28, 4  ;;  %s33_s5 = sadd.s32 1, %s1026_s19  ;;  %s170_s29 = int_to_ptr.vmem [resolvable:$true] %s169_s29 }
  0x12   : > { %s1327_s27 = scalar_select %p1123_p8, 1, 0 }
  0x13   : > { %p776_p9 = pneg %p1123_p8  ;;  %s886_s8 = scalar_lea.hbm %s1315_s1, 3072 }
  0x14   : > { %p887_p12 = scmp.ne.s32.totalorder %s1315_s1, %s886_s8  ;;  %p893_p5 = scmp.lt.u32.totalorder %s886_s8, %s1315_s1 }
  0x15   : > { %p1132_p11 = pnand %p776_p9, %p1103_p1 }
  0x17   : > { %p888_p13 = pneg %p1132_p11 }
  0x19   : > { %p889_p0 = pnand %p888_p13, %p887_p12 }
  0x1b   : > { %p890_p3 = pneg %p889_p0 }
  0x1d   : > { %p895_p7 = pnand %p893_p5, %p890_p3 }
  0x1f   : > { %898 = shalt.err (!%p895_p7)
}
  0x20   : > { %s899_s13 = scalar_lea.vmem %s170_s29, 3072  ;;  %p907_p1 = scmp.lt.s32.totalorder %s170_s29, %s170_s29 }
  0x21   : > { %p900_p9 = scmp.ne.s32.totalorder %s170_s29, %s899_s13  ;;  %p908_p4 = scmp.lt.s32.totalorder %s899_s13, %s899_s13 }
  0x23   : > { %p902_p10 = pnand %p900_p9, %p888_p13  ;;  %p909_p8 = por %p908_p4, %p907_p1 }
  0x25   : > { %p903_p6 = pneg %p902_p10 }
  0x27   : > { %p910_p2 = pnand %p909_p8, %p903_p6 }
  0x29   : > { %913 = shalt.err (!%p910_p2)
}
  0x2a   : > { %s1033_s14 = smov 192   ;;  %s1034_s21 = smov 12  }
  0x2b   : > { %779 = dma.hbm_to_vmem [thread:$0]  (!%p1132_p11), %s1315_s1, 3072, %s170_s29, [#allocation6], %s1033_s14, %s1033_s14, %s1034_s21  }
  0x2c   : > { %p35_p1 = scmp.ge.s32.totalorder %s33_s5, 2  ;;  %s42_s6 = sadd.s32 1, %s1018_s17 }
  0x2d   : > { %p49_p2 = scmp.ne.s32.totalorder %s1018_s17, %s1014_s16  ;;  %p50_p4 = scmp.eq.s32.totalorder %s1030_s20, 0 }
  0x2e   : > { %s1344_s5 = smov (%p35_p1, %s33_s5), 0  ;;  %p1330_p8 = scmp.ne.s32.totalorder %s1324_s24, 0 }
  0x2f   : > { %p1159_p6 = por %p50_p4, %p49_p2  ;;  %s37_s30 = ssub.s32 %s1026_s19, %s1344_s5 }
  0x30   : > { %p1165_p10 = por %p1330_p8, %p49_p2  ;;  %p789_p12 = scmp.lt.s32.totalorder %s1030_s20, 2 }
  0x31   : > { %p40_p11 = scmp.eq.s32.totalorder %s37_s30, 0  ;;  %s189_s29 = sand.u32 1, %s1018_s17  }
  0x32   : > { %s695_s9 = sshll.u32 %s189_s29, 4  ;;  %s732_s11 = sshll.u32 %s1026_s19, 8 }
  0x33   : > { %s1174_s10 = scalar_select %p40_p11, %s1018_s17, %s42_s6  }
  0x34   : > { %s1180_s14 = scalar_lea.hbm %s1314_s0, %s732_s11  ;;  %s193_s24 = scalar_lea.vmem [#allocation2], %s695_s9 }
  0x35   : > { %s202_s21 = sshll.u32 %s193_s24, 4  ;;  %p1186_p13 = pnand %p789_p12, %p1159_p6  ;;  %s1182_s21 = int_to_ptr.vmem [resolvable:$true] %s202_s21 }
  0x36   : > { %s1190_s28 = scalar_lea.sflag [#allocation3], %s189_s29  ;;  %s914_s6 = scalar_lea.hbm %s1180_s14, 256 }
  0x37   : > { %p915_p0 = scmp.ne.s32.totalorder %s1180_s14, %s914_s6  ;;  %p916_p3 = pneg %p1186_p13 }
  0x38   : > { %s919_s7 = scalar_lea.hbm %s1314_s0, 512  ;;  %p920_p9 = scmp.lt.u32.totalorder %s1180_s14, %s1314_s0 }
  0x39   : > { %p917_p5 = pnand %p916_p3, %p915_p0  ;;  %p921_p1 = scmp.lt.u32.totalorder %s919_s7, %s914_s6 }
  0x3a   : > { %p923_p4 = scmp.lt.u32.totalorder %s914_s6, %s1180_s14 }
  0x3b   : > { %p918_p7 = pneg %p917_p5  ;;  %p922_p2 = por %p921_p1, %p920_p9 }
  0x3d   : > { %p924_p6 = por %p923_p4, %p922_p2 }
  0x3f   : > { %p925_p8 = pnand %p924_p6, %p918_p7 }
  0x41   : > { %928 = shalt.err (!%p925_p8)
}
  0x42   : > { %s929_s29 = scalar_lea.vmem %s1182_s21, 256  ;;  %s1035_s13 = smov [#allocation2]  }
  0x43   : > { %p930_p12 = scmp.ne.s32.totalorder %s1182_s21, %s929_s29  ;;  %s934_s24 = sshll.u32 %s1035_s13, 4  ;;  %s935_s24 = int_to_ptr.vmem [resolvable:$false] %s934_s24 }
  0x44   : > { %s936_s30 = scalar_lea.vmem %s935_s24, 512  ;;  %p937_p5 = scmp.lt.s32.totalorder %s1182_s21, %s935_s24 }
  0x45   : > { %p932_p11 = pnand %p930_p12, %p916_p3  ;;  %p938_p9 = scmp.lt.s32.totalorder %s936_s30, %s929_s29 }
  0x47   : > { %p933_p0 = pneg %p932_p11  ;;  %p939_p1 = por %p938_p9, %p937_p5 }
  0x49   : > { %p940_p2 = pnand %p939_p1, %p933_p0 }
  0x4b   : > { %943 = shalt.err (!%p940_p2)
}
  0x4c   : > { %s1036_s6 = smov 128   ;;  %s1037_s9 = smov 8  }
  0x4d   : > { %783 = dma.hbm_to_vmem [thread:$0]  (!%p1186_p13), %s1180_s14, 256, %s1182_s21, %s1190_s28, %s1036_s6, %s1036_s6, %s1037_s9  }
  0x4e   : > { %p1333_p3 = scmp.ne.s32.totalorder %s1327_s27, 0 }
  0x4f   : > { %s1221_s7 = sand.u32 (!%p1333_p3), 1, %s1014_s16   ;;  %p1334_p7 = scmp.ne.s32.totalorder (!%p1333_p3), %s1325_s25, 0 }
  0x50   : > { %214 = sbr.rel (%p1333_p3) target bundleno = 643 (0x283), region = 36  ;;  %s699_s11 = sshll.u32 (!%p1333_p3), %s1221_s7, 4 }
  0x51   : > { %s217_s12 = scalar_lea.sflag (!%p1333_p3), [#allocation3], %s1221_s7  ;;  %s220_s29 = scalar_lea.vmem (!%p1333_p3), [#allocation2], %s699_s11 }
  0x57   : > { %997 = dma.done.wait (%p1334_p7), %s217_s12, 256  }
  0x58   : > { %999 = vsyncadd (%p1334_p7), %s217_s12, 4294967040  ;;  %p1335_p4 = scmp.ne.s32.totalorder %s1323_s23, 0 }
  0x5a   : > { %1001 = dma.done.wait (%p1335_p4), [#allocation6], 3072  }
  0x5b   : > { %1003 = vsyncadd (%p1335_p4), [#allocation6], 4294964224  ;;  %v252_v0 = vld [vmem:[%s220_s29] sm:$0xff]  ;;  %v253_v1 = vld [vmem:[%s220_s29 + $0x8] sm:$0xff]  ;;  %v1038_v4 = vmov 0.0   ;;  %v1039_v30 = vmov 0   ;;  %v278_v40 = vlaneseq }
  0x5c   : > { %255 = vadd.xlane.f32.xlu0 %v252_v0  ;;  %v850_v2 = vld [vmem:[#allocation5 + $0x4] ss:$12 sps:$4 sm:$0xff]   ;;  %v852_v3 = vld [vmem:[#allocation5] ss:$12 sps:$4 sm:$0xff]   ;;  %746 = vmatprep.subr.bf16.mxu1 %v1038_v4  ;;  %v853_v5 = vld [vmem:[#allocation5 + $0x8] ss:$12 sps:$4 sm:$0xff]  }
  0x5d   : > { %v854_v6 = vld [vmem:[#allocation5 + $0x1c] ss:$12 sps:$4 sm:$0xff]   ;;  %468 = vmatprep.subr.bf16.mxu0 %v850_v2  ;;  %747 = vmatpush3.bf16.msra.mxu1 %v853_v5  ;;  %v856_v15 = vld [vmem:[#allocation5 + $0x18] ss:$12 sps:$4 sm:$0xff]   ;;  %v857_v16 = vld [vmem:[#allocation5 + $0x20] ss:$12 sps:$4 sm:$0xff]  }
  0x5e   : > { %469 = vmatpush1.bf16.msra.mxu0 %v852_v3  ;;  %748 = vmatprep.subr.bf16.mxu1 %v1038_v4  ;;  %v858_v17 = vld [vmem:[#allocation5 + $0x34] ss:$12 sps:$4 sm:$0xff]   ;;  %v860_v18 = vld [vmem:[#allocation5 + $0x30] ss:$12 sps:$4 sm:$0xff]   ;;  %v861_v19 = vld [vmem:[#allocation5 + $0x38] ss:$12 sps:$4 sm:$0xff]  }
  0x5f   : > { %470 = vmatprep.subr.bf16.mxu0 %v854_v6  ;;  %v862_v20 = vld [vmem:[#allocation5 + $0x4c] ss:$12 sps:$4 sm:$0xff]   ;;  %v864_v21 = vld [vmem:[#allocation5 + $0x48] ss:$12 sps:$4 sm:$0xff]   ;;  %v865_v22 = vld [vmem:[#allocation5 + $0x50] ss:$12 sps:$4 sm:$0xff]   ;;  %500 = vmatprep.mubr.bf16.mxu0 %v1039_v30 }
  0x60   : > { %257 = vadd.xlane.f32.xlu0 %v253_v1  ;;  %v866_v23 = vld [vmem:[#allocation5 + $0x64] ss:$12 sps:$4 sm:$0xff]   ;;  %v868_v24 = vld [vmem:[#allocation5 + $0x60] ss:$12 sps:$4 sm:$0xff]   ;;  %v869_v25 = vld [vmem:[#allocation5 + $0x68] ss:$12 sps:$4 sm:$0xff]  }
  0x61   : > { %749 = vmatpush3.bf16.msra.mxu1 %v857_v16  ;;  %v870_v26 = vld [vmem:[#allocation5 + $0x7c] ss:$12 sps:$4 sm:$0xff]   ;;  %v872_v27 = vld [vmem:[#allocation5 + $0x78] ss:$12 sps:$4 sm:$0xff]   ;;  %v873_v28 = vld [vmem:[#allocation5 + $0x80] ss:$12 sps:$4 sm:$0xff]  }
  0x62   : > { %471 = vmatpush1.bf16.msra.mxu0 %v856_v15  ;;  %750 = vmatprep.subr.bf16.mxu1 %v1038_v4  ;;  %v874_v29 = vld [vmem:[#allocation5 + $0x94] ss:$12 sps:$4 sm:$0xff]   ;;  %vm1040_vm0 = vmmov 0   ;;  %v876_v31 = vld [vmem:[#allocation5 + $0x90] ss:$12 sps:$4 sm:$0xff]   ;;  %v279_v43 = vshrl.u32 %v278_v40, 7 }
  0x63   : > { %472 = vmatprep.subr.bf16.mxu0 %v858_v17  ;;  %762 = vmatprep.mubr.msk.bf16.mxu1 %vm1040_vm0, %v1038_v4  ;;  %v877_v32 = vld [vmem:[#allocation5 + $0x98] ss:$12 sps:$4 sm:$0xff]   ;;  %v880_v34 = vld [vmem:[#allocation5 + $0xa8] ss:$12 sps:$4 sm:$0xff]   ;;  %v881_v35 = vld [vmem:[#allocation5 + $0xb0] ss:$12 sps:$4 sm:$0xff]  }
  0x64   : > { %v878_v33 = vld [vmem:[#allocation5 + $0xac] ss:$12 sps:$4 sm:$0xff]   ;;  %v280_v44 = vsub.s32 0, %v279_v43  ;;  %v254_v45 = vld [vmem:[%s1317_s3] sm:$0x3]  ;;  %v286_v49 = vsub.s32 1, %v279_v43 }
  0x65   : > { %751 = vmatpush3.bf16.msra.mxu1 %v861_v19  ;;  %v335_v58 = vsub.s32 2, %v279_v43  ;;  %v323_v59 = vld [vmem:[%s1316_s2] sm:$0x7]  ;;  %s766_s21 = smul.u32 24, %s1221_s7  ;;  %s577_s6 = scalar_lea.sflag [#allocation4], %s1221_s7 }
  0x66   : > { %473 = vmatpush1.bf16.msra.mxu0 %v860_v18  ;;  %752 = vmatprep.subr.bf16.mxu1 %v1038_v4  ;;  %v281_v48 = vrot.slane %v254_v45, %v280_v44  ;;  %v287_v53 = vrot.slane %v254_v45, %v286_v49  ;;  %v328_v60 = vrot.slane %v323_v59, %v280_v44  ;;  %s767_s13 = smul.u32 384, %s1022_s18  ;;  %s1041_s11 = smov [#allocation7]  }
  0x67   : > { %474 = vmatprep.subr.bf16.mxu0 %v862_v20  ;;  %v336_v61 = vrot.slane %v323_v59, %v335_v58  ;;  %v332_v62 = vrot.slane %v323_v59, %v286_v49  ;;  %s248_s22 = scalar_lea.vmem [#allocation7], %s766_s21  ;;  %s948_s12 = sshll.u32 %s1041_s11, 4  ;;  %s949_s12 = int_to_ptr.vmem [resolvable:$false] %s948_s12 }
  0x68   : > { %s593_s28 = sshll.u32 %s248_s22, 4  ;;  %s1265_s30 = scalar_lea.hbm %s1318_s4, %s767_s13  ;;  %s1260_s28 = int_to_ptr.vmem [resolvable:$true] %s593_s28 }
  0x69   : > { %753 = vmatpush3.bf16.msra.mxu1 %v865_v22  ;;  %s944_s9 = scalar_lea.vmem %s1260_s28, 384  ;;  %s950_s29 = scalar_lea.vmem %s949_s12, 768 }
  0x6a   : > { %475 = vmatpush1.bf16.msra.mxu0 %v864_v21  ;;  %754 = vmatprep.subr.bf16.mxu1 %v1038_v4  ;;  %p945_p13 = scmp.ne.s32.totalorder %s1260_s28, %s944_s9  ;;  %p951_p12 = scmp.lt.s32.totalorder %s1260_s28, %s949_s12 }
  0x6b   : > { %476 = vmatprep.subr.bf16.mxu0 %v866_v23  ;;  %p952_p11 = scmp.lt.s32.totalorder %s950_s29, %s944_s9 }
  0x6c   : > { %p946_p6 = pnand %p945_p13, %p1165_p10 }
  0x6d   : > { %755 = vmatpush3.bf16.msra.mxu1 %v869_v25  ;;  %p953_p0 = por %p952_p11, %p951_p12 }
  0x6e   : > { %477 = vmatpush1.bf16.msra.mxu0 %v868_v24  ;;  %756 = vmatprep.subr.bf16.mxu1 %v1038_v4  ;;  %p947_p8 = pneg %p946_p6 }
  0x6f   : > { %478 = vmatprep.subr.bf16.mxu0 %v870_v26 }
  0x70   : > { %p954_p5 = pnand %p953_p0, %p947_p8 }
  0x71   : > { %757 = vmatpush3.bf16.msra.mxu1 %v873_v28 }
  0x72   : > { %479 = vmatpush1.bf16.msra.mxu0 %v872_v27  ;;  %758 = vmatprep.subr.bf16.mxu1 %v1038_v4 }
  0x73   : > { %480 = vmatprep.subr.bf16.mxu0 %v874_v29 }
  0x75   : > { %759 = vmatpush3.bf16.msra.mxu1 %v877_v32 }
  0x76   : > { %481 = vmatpush1.bf16.msra.mxu0 %v876_v31  ;;  %760 = vmatprep.subr.bf16.mxu1 %v1038_v4 }
  0x77   : > { %482 = vmatprep.subr.bf16.mxu0 %v878_v33 }
  0x79   : > { %761 = vmatpush3.bf16.msra.mxu1 %v881_v35 }
  0x7a   : > { %483 = vmatpush1.bf16.msra.mxu0 %v880_v34 }
  0xe9   : > { %v256_v7 = vpop.xlane.xlu0 %255 }
  0xea   : > { %v260_v8 = vmul.f32 0.0078125, %v256_v7 }
  0xec   : > { %v1235_v9 = vsub.f32 %v252_v0, %v260_v8 }
  0xed   : > { %v258_v10 = vpop.xlane.xlu0 %257 }
  0xee   : > { %v261_v11 = vmul.f32 0.0078125, %v258_v10  ;;  %v264_v12 = vmul.f32 %v1235_v9, %v1235_v9 }
  0xf0   : > { %v1239_v13 = vsub.f32 %v253_v1, %v261_v11  ;;  %266 = vadd.xlane.f32.xlu1 %v264_v12 }
  0xf2   : > { %v265_v14 = vmul.f32 %v1239_v13, %v1239_v13 }
  0xf4   : > { %268 = vadd.xlane.f32.xlu1 %v265_v14 }
 0x17d   : > { %v267_v36 = vpop.xlane.xlu1 %266 }
 0x17e   : > { %v270_v37 = vmul.f32 0.0078125, %v267_v36 }
 0x180   : > { %v272_v38 = vadd.f32 1e-05, %v270_v37 }
 0x181   : > { %v269_v39 = vpop.xlane.xlu1 %268 }
 0x182   : > { %882 = vrsqrt.f32 %v272_v38  ;;  %v271_v41 = vmul.f32 0.0078125, %v269_v39 }
 0x184   : > { %v273_v42 = vadd.f32 1e-05, %v271_v41 }
 0x186   : > { %884 = vrsqrt.f32 %v273_v42 }
 0x18c   : > { %v883_v46 = vpop.eup %882 }
 0x18d   : > { %v276_v47 = vmul.f32 %v883_v46, %v1235_v9 }
 0x18f   : > { %v282_v52 = vmul.f32 %v281_v48, %v276_v47 }
 0x190   : > { %v885_v50 = vpop.eup %884 }
 0x191   : > { %v277_v51 = vmul.f32 %v885_v50, %v1239_v13  ;;  %v288_v55 = vadd.f32 %v287_v53, %v282_v52 }
 0x193   : > { %v283_v54 = vmul.f32 %v281_v48, %v277_v51 }
 0x195   : > { %v289_v56 = vadd.f32 %v287_v53, %v283_v54 }
 0x197   : > { %v290_v57 = vpack.c.bf16 %v289_v56, %v288_v55 }
 0x199   : > { %501 = vmatmul.mubr.bf16.vlgmr.msra.gmra.mrb[0].mxu0 %v290_v57  ;;  %763 = vmatmul.mubr.bf16.vlgmr.msra.gmra.mrb[0].mxu1 %v290_v57 }
 0x26c   : > { %v502_v63 = vpop.f32.mrb[0].mxu0  ;;  %v545_v0 = vpop.f32.mrb[0].mxu1 }
 0x26d   : > { %v503_v1 = vadd.f32 %v502_v63, %v328_v60  ;;  %v546_v2 = vadd.f32 %v545_v0, %v336_v61  ;;  %v504_v3 = vpop.f32.mrb[1].mxu0  ;;  %v764_v4 = vpop.f32.mrb[1].mxu1 }
 0x26e   : > { %v505_v5 = vadd.f32 %v504_v3, %v332_v62  ;;  %v506_v6 = vpop.f32.mrb[2].mxu0  ;;  %v548_v7 = vpop.f32.mrb[2].mxu1 }
 0x26f   : > { %v734_v8 = vpack.c.bf16 %v546_v2, %v546_v2  ;;  %v507_v9 = vadd.f32 %v506_v6, %v328_v60  ;;  %v549_v10 = vadd.f32 %v548_v7, %v336_v61  ;;  %v508_v11 = vpop.f32.mrb[3].mxu0  ;;  %v765_v12 = vpop.f32.mrb[3].mxu1 }
 0x270   : > { %v733_v13 = vpack.c.bf16 %v505_v5, %v503_v1  ;;  %v509_v14 = vadd.f32 %v508_v11, %v332_v62 }
 0x271   : > { %573 = vst [vmem:[%s248_s22 + $0x8] sm:$0xf] %v734_v8  ;;  %v736_v15 = vpack.c.bf16 %v549_v10, %v549_v10 }
 0x272   : > { %572 = vst [vmem:[%s248_s22] sm:$0xff] %v733_v13  ;;  %v735_v16 = vpack.c.bf16 %v509_v14, %v507_v9 }
 0x273   : > { %575 = vst [vmem:[%s248_s22 + $0x14] sm:$0xf] %v736_v15 }
 0x274   : > { %574 = vst [vmem:[%s248_s22 + $0xc] sm:$0xff] %v735_v16 }
 0x275   : > { %957 = shalt.err (!%p954_p5)
}
 0x276   : > { %s958_s23 = scalar_lea.hbm %s1265_s30, 384  ;;  %s962_s14 = scalar_lea.hbm %s1318_s4, 768 }
 0x277   : > { %p959_p9 = scmp.ne.s32.totalorder %s1265_s30, %s958_s23  ;;  %p963_p3 = scmp.lt.u32.totalorder %s1265_s30, %s1318_s4 }
 0x278   : > { %p964_p7 = scmp.lt.u32.totalorder %s962_s14, %s958_s23  ;;  %p966_p13 = scmp.lt.u32.totalorder %s958_s23, %s1265_s30 }
 0x279   : > { %p960_p1 = pnand %p959_p9, %p1165_p10 }
 0x27a   : > { %p965_p4 = por %p964_p7, %p963_p3 }
 0x27b   : > { %p961_p2 = pneg %p960_p1 }
 0x27c   : > { %p967_p6 = por %p966_p13, %p965_p4 }
 0x27e   : > { %p968_p8 = pnand %p967_p6, %p961_p2 }
 0x280   : > { %971 = shalt.err (!%p968_p8)
}
 0x281   : > { %s1042_s13 = smov 192   ;;  %s1043_s18 = smov 12  }
 0x282   : > { %774 = dma.vmem_to_hbm [thread:$0]  (%p1165_p10), %s1260_s28, 384, %s1265_s30, %s577_s6, %s1042_s13, %s1042_s13, %s1043_s18  }
 0x283 PF: > { %s608_s24 = sand.u32 1, %s1010_s15   ;;  %p1336_p12 = scmp.ne.s32.totalorder %s1326_s26, 0 }
 0x284   : > { %p1337_p11 = scmp.ge.s32.totalorder %s1030_s20, 2  ;;  %s609_s9 = scalar_lea.sflag [#allocation4], %s608_s24 }
 0x286   : > { %p785_p0 = pnand %p1337_p11, %p1336_p12 }
 0x288   : > { %1005 = dma.done.wait (!%p785_p0), %s609_s9, 384  }
 0x289   : > { %1007 = vsyncadd (!%p785_p0), %s609_s9, 4294966912  ;;  %s21_s20 = sadd.s32 1, %s1030_s20   ;;  %s1338_s15 = smov %s1014_s16 }
 0x28a   : > { %p18_p5 = scmp.ge.s32.totalorder %s21_s20, 4   ;;  %s1339_s16 = smov %s1018_s17 }
 0x28b   : > { %s1340_s17 = smov %s1174_s10  ;;  %s1341_s18 = smov %s1026_s19 }
 0x28c   : > { %s1342_s19 = smov %s1344_s5  ;;  %20 = sbr.rel (!%p18_p5) target bundleno = 7 (0x7), region = 85 }
 0x293   :  { %614 = vsyncpa [#allocation3], 1 }
 0x294   :  { %616 = vsyncpa [#allocation3 + $0x1], 1 }
 0x295   :  { %617 = vsyncpa [#allocation6], 1 }
 0x296   :  { %618 = vsyncpa [#allocation4], 1 }
 0x297   :  { %620 = vsyncpa [#allocation4 + $0x1], 1 }

</bundles_post_ra>
